<compile_context>
chip_gen: v6e
topology: v6e:2x2x1
jax: 0.10.0
libtpu: 0.0.40
codegen_flags: <defaults>
</compile_context>

<pallas_src>
import math

import jax
import jax.numpy as jnp
import numpy as np
from jax import lax
from jax.experimental import pallas as pl
from jax.experimental.pallas import tpu as pltpu

_LANE = 128

_NN_DIMS = (((1,), (0,)), ((), ()))   # a[m,k] @ b[k,n]   -> [m,n]
_NT_DIMS = (((1,), (1,)), ((), ()))   # a[m,k] @ b[n,k]^T -> [m,n]


def _round_up(x, m):
    return ((x + m - 1) // m) * m


def _vmem_capacity_bytes():
    """Physical VMEM per TensorCore (generation-aware), conservative fallback."""
    try:
        info = pltpu.get_tpu_info()
        for name in ("vmem_capacity_bytes", "vmem_size_bytes", "vmem_bytes"):
            cap = getattr(info, name, None)
            if cap:
                return int(cap)
    except Exception:
        pass
    return 64 * 1024 * 1024      # v7x per-TC size: safe lower bound for every generation


def _proj_vmem_bytes(bp, cin, kcp, vcp):
    tiles = 2 * (bp * cin * 2 + bp * (kcp + vcp) * 2)          # x + qk/v tiles, dbl-buf bf16
    weights = 2 * (cin * (kcp + vcp) * 2 + (kcp + vcp) * 4)    # wqk/wv (bf16) + biases (f32)
    interm = bp * (kcp + vcp) * 4                              # f32 matmul results
    return tiles + weights + interm


def _attn_vmem_bytes(bq, bkv, kcp, vcp, cout):
    tiles = 2 * (bq * kcp * 2 + bkv * (kcp + vcp) * 2 + cout * bq * 4)
    weights = 2 * (cout * vcp * 2 + cout * 4)
    scratch = bq * (vcp + 2) * 4                               # acc + m + l
    interm = 3 * bq * bkv * 4 + bq * vcp * 4                   # s (f32) + bf16/f32 p copies + ctx
    return tiles + weights + scratch + interm


def _choose_attn_blocks(n_pad, batch, kcp, vcp, cout, budget):
    """Largest 512/256/128 tiles (multiples of 256 preferred) that fit the VMEM budget."""
    cands = [c for c in (512, 256, 128) if n_pad % c == 0] or [_LANE]
    bq, bkv = cands[-1], cands[-1]
    done = False
    for cq in cands:
        for ck in cands:
            if 1.5 * _attn_vmem_bytes(cq, ck, kcp, vcp, cout) <= budget:
                bq, bkv, done = cq, ck, True
                break
        if done:
            break
    # Guarantee >=2 tiles on the parallel axes so both TensorCores get work (v7x megacore).
    while (batch * (n_pad // bq) < 2 and bq > _LANE
           and (bq // 2) % _LANE == 0 and n_pad % (bq // 2) == 0):
        bq //= 2
    return bq, bkv


def _projection_kernel(x_ref, wqk_ref, bqk_ref, wv_ref, bv_ref, qk_ref, v_ref):
    """Shared q/k projection and v projection, computed once per spatial position."""
    x = x_ref[0]                                                        # [bp, Cin] bf16
    qk = lax.dot_general(x, wqk_ref[...], _NN_DIMS,
                         preferred_element_type=jnp.float32) + bqk_ref[...]
    v = lax.dot_general(x, wv_ref[...], _NN_DIMS,
                        preferred_element_type=jnp.float32) + bv_ref[...]
    qk_ref[0] = qk.astype(jnp.bfloat16)
    v_ref[0] = v.astype(jnp.bfloat16)


def _make_attention_kernel(n_valid):
    """Flash attention + folded f_out.  n_valid is None when N needs no key masking."""

    def kernel(q_ref, k_ref, v_ref, wot_ref, bo_ref, o_ref, m_sc, l_sc, acc_sc):
        ki = pl.program_id(2)

        @pl.when(ki == 0)
        def _init():
            m_sc[...] = jnp.full_like(m_sc, -jnp.inf)
            l_sc[...] = jnp.zeros_like(l_sc)
            acc_sc[...] = jnp.zeros_like(acc_sc)

        # Scores: NT matmul on precomputed bf16 q/k tiles, f32 accumulation (no transpose).
        s = lax.dot_general(q_ref[0], k_ref[0], _NT_DIMS,
                            preferred_element_type=jnp.float32)         # [bq, bkv]

        if n_valid is not None:    # mask spatial padding; emitted only when padding exists
            bkv = s.shape[1]
            key_idx = ki * bkv + lax.broadcasted_iota(jnp.int32, s.shape, 1)
            s = jnp.where(key_idx < n_valid, s, -jnp.inf)

        # Online softmax update.
        m_prev = m_sc[...]
        m_new = jnp.maximum(m_prev, jnp.max(s, axis=-1, keepdims=True))
        alpha = jnp.exp(m_prev - m_new)
        # bf16 exp (2x EUP throughput on v6e/v7x); p feeds the p@v matmul directly.
        p = jnp.exp((s - m_new).astype(jnp.bfloat16))                    # [bq, bkv] bf16
        l_sc[...] = alpha * l_sc[...] + jnp.sum(p.astype(jnp.float32),
                                                axis=-1, keepdims=True)
        acc_sc[...] = alpha * acc_sc[...] + lax.dot_general(
            p, v_ref[0], _NN_DIMS, preferred_element_type=jnp.float32)
        m_sc[...] = m_new

        @pl.when(ki == pl.num_programs(2) - 1)
        def _finalize():
            # Exact reciprocal: runs once per query tile on a [bq, 1] vector (cheap).
            ctx = acc_sc[...] * pl.reciprocal(l_sc[...], approx=False)   # [bq, Vcp]
            # f_out 1x1 conv, emitted channel-major [Cout, bq] (NT matmul, lane-dense store).
            out_t = lax.dot_general(wot_ref[...], ctx.astype(jnp.bfloat16), _NT_DIMS,
                                    preferred_element_type=jnp.float32) + bo_ref[...]
            o_ref[0] = out_t.astype(o_ref.dtype)

    return kernel


def self_attention_block(x_nchw, params, *, block_q=None, block_k=None):
    """x_nchw: [B, Cin, H, W] float32.  Returns [B, Cout, H, W] float32."""
    B, Cin, H, W = x_nchw.shape
    N = H * W
    Np = _round_up(N, _LANE)

    w_key, b_key = params["wk"], params["bk"]      # [Cin, Kc], [Kc]  (eval-mode BN folded)
    w_val, b_val = params["wv"], params["bv"]      # [Cin, Vc], [Vc]
    w_out, b_out = params["wo"], params["bo"]      # [Vc, Cout], [Cout]
    Kc, Vc, Cout = w_key.shape[1], w_val.shape[1], w_out.shape[1]
    Kcp, Vcp = _round_up(Kc, _LANE), _round_up(Vc, _LANE)

    # Fold 1/sqrt(Kc) into the shared q/k projection (query == key -> Kc**-0.25 each);
    # lane-pad and bf16-cast every streamed weight.  Biases stay f32 (tiny).
    qk_scale = float(Kc) ** -0.25
    wqk_p = jnp.zeros((Cin, Kcp), jnp.bfloat16).at[:, :Kc].set(
        (w_key * qk_scale).astype(jnp.bfloat16))
    bqk_p = jnp.zeros((1, Kcp), jnp.float32).at[0, :Kc].set(b_key * qk_scale)
    wv_p = jnp.zeros((Cin, Vcp), jnp.bfloat16).at[:, :Vc].set(w_val.astype(jnp.bfloat16))
    bv_p = jnp.zeros((1, Vcp), jnp.float32).at[0, :Vc].set(b_val)
    wo_t = jnp.zeros((Cout, Vcp), jnp.bfloat16).at[:, :Vc].set(w_out.T.astype(jnp.bfloat16))
    bo_p = b_out.reshape(Cout, 1).astype(jnp.float32)

    # Spatial-major bf16 input [B, Np, Cin]; read exactly once by the projection prologue.
    x_bnc = jnp.transpose(x_nchw.reshape(B, Cin, N), (0, 2, 1)).astype(jnp.bfloat16)
    if Np != N:
        x_bnc = jnp.pad(x_bnc, ((0, 0), (0, Np - N), (0, 0)))

    vmem_cap = _vmem_capacity_bytes()
    budget = int(0.70 * vmem_cap)        # ~45 MiB on v7x (64 MiB/TC), ~90 MiB on v5e/v6e

    # ---- projection prologue: qk = x@Wqk + bqk, v = x@Wv + bv (bf16, lane-padded) ----
    bp_cands = [c for c in (512, 256, 128) if Np % c == 0] or [_LANE]
    bp = next((c for c in bp_cands if 1.5 * _proj_vmem_bytes(c, Cin, Kcp, Vcp) <= budget),
              bp_cands[-1])
    proj_vmem = int(min(budget, max(2 * _proj_vmem_bytes(bp, Cin, Kcp, Vcp),
                                    16 * 1024 * 1024)))

    qk_bnk, v_bnv = pl.pallas_call(
        _projection_kernel,
        out_shape=(jax.ShapeDtypeStruct((B, Np, Kcp), jnp.bfloat16),
                   jax.ShapeDtypeStruct((B, Np, Vcp), jnp.bfloat16)),
        grid_spec=pltpu.PrefetchScalarGridSpec(
            num_scalar_prefetch=0,
            grid=(B, Np // bp),
            in_specs=[
                pl.BlockSpec((1, bp, Cin), lambda b, i: (b, i, 0)),      # x tile
                pl.BlockSpec((Cin, Kcp), lambda b, i: (0, 0)),           # wqk (BN+scale folded)
                pl.BlockSpec((1, Kcp), lambda b, i: (0, 0)),             # bqk
                pl.BlockSpec((Cin, Vcp), lambda b, i: (0, 0)),           # wv
                pl.BlockSpec((1, Vcp), lambda b, i: (0, 0)),             # bv
            ],
            out_specs=(pl.BlockSpec((1, bp, Kcp), lambda b, i: (b, i, 0)),
                       pl.BlockSpec((1, bp, Vcp), lambda b, i: (b, i, 0))),
        ),
        compiler_params=pltpu.CompilerParams(
            dimension_semantics=("parallel", "parallel"),
            vmem_limit_bytes=proj_vmem),
    )(x_bnc, wqk_p, bqk_p, wv_p, bv_p)

    # ---- flash attention + folded f_out, channel-major output [B, Cout, Np] ----
    bq, bkv = _choose_attn_blocks(Np, B, Kcp, Vcp, Cout, budget)
    if block_q is not None:
        assert block_q % _LANE == 0 and Np % block_q == 0
        bq = block_q
    if block_k is not None:
        assert block_k % _LANE == 0 and Np % block_k == 0
        bkv = block_k
    attn_vmem = int(min(budget, max(2 * _attn_vmem_bytes(bq, bkv, Kcp, Vcp, Cout),
                                    16 * 1024 * 1024)))

    n_valid = N if Np != N else None
    out_bcn = pl.pallas_call(
        _make_attention_kernel(n_valid),
        out_shape=jax.ShapeDtypeStruct((B, Cout, Np), jnp.float32),
        grid_spec=pltpu.PrefetchScalarGridSpec(
            num_scalar_prefetch=0,
            grid=(B, Np // bq, Np // bkv),
            in_specs=[
                pl.BlockSpec((1, bq, Kcp), lambda b, qi, ki: (b, qi, 0)),    # q rows
                pl.BlockSpec((1, bkv, Kcp), lambda b, qi, ki: (b, ki, 0)),   # k rows
                pl.BlockSpec((1, bkv, Vcp), lambda b, qi, ki: (b, ki, 0)),   # v rows
                pl.BlockSpec((Cout, Vcp), lambda b, qi, ki: (0, 0)),         # wo^T (bf16)
                pl.BlockSpec((Cout, 1), lambda b, qi, ki: (0, 0)),           # bo
            ],
            out_specs=pl.BlockSpec((1, Cout, bq), lambda b, qi, ki: (b, 0, qi)),
            scratch_shapes=[
                pltpu.VMEM((bq, 1), jnp.float32),      # m (running max)
                pltpu.VMEM((bq, 1), jnp.float32),      # l (running denom)
                pltpu.VMEM((bq, Vcp), jnp.float32),    # acc
            ],
        ),
        compiler_params=pltpu.CompilerParams(
            dimension_semantics=("parallel", "parallel", "arbitrary"),
            vmem_limit_bytes=attn_vmem),
    )(qk_bnk, qk_bnk, v_bnv, wo_t, bo_p)

    if Np != N:
        out_bcn = out_bcn[:, :, :N]
    return out_bcn.reshape(B, Cout, H, W)


def init_params(key, in_channels, key_channels, value_channels, out_channels=None):
    """Deterministic init mirroring the PyTorch module's __init__."""
    if out_channels is None:
        out_channels = in_channels
    k1, k2 = jax.random.split(key, 2)

    def conv1x1_init(k, cin, cout):
        bound = 1.0 / math.sqrt(cin)    # PyTorch Conv2d default bound for k=1
        kw, kb = jax.random.split(k)
        w = jax.random.uniform(kw, (cin, cout), jnp.float32, -bound, bound)
        b = jax.random.uniform(kb, (cout,), jnp.float32, -bound, bound)
        return w, b

    # f_key / f_query (shared): Conv2d 1x1 + BatchNorm2d folded in eval mode
    # (mean=0, var=1, gamma=1, beta=0 -> pure 1/sqrt(1+eps) scale).
    # TODO(synk): training-mode BatchNorm (batch statistics) is not reproduced.
    wk, bk = conv1x1_init(k1, in_channels, key_channels)
    bn_scale = 1.0 / math.sqrt(1.0 + 1e-5)
    wk, bk = wk * bn_scale, bk * bn_scale

    wv, bv = conv1x1_init(k2, in_channels, value_channels)

    # f_out: zero-initialized exactly like the PyTorch module.
    wo = jnp.zeros((value_channels, out_channels), jnp.float32)
    bo = jnp.zeros((out_channels,), jnp.float32)
    return {"wk": wk, "bk": bk, "wv": wv, "bv": bv, "wo": wo, "bo": bo}


def reference_jax(x_nchw, params, key_channels):
    """Plain-JAX f32 reference mirroring the PyTorch forward (eval-mode BN)."""
    B, Cin, H, W = x_nchw.shape
    N = H * W
    x = jnp.transpose(x_nchw.reshape(B, Cin, N), (0, 2, 1))          # [B,N,Cin]
    qk = x @ params["wk"] + params["bk"]                             # [B,N,Kc]
    v = x @ params["wv"] + params["bv"]                              # [B,N,Vc]
    sim = jnp.einsum("bnk,bmk->bnm", qk, qk) / math.sqrt(key_channels)
    sim = jax.nn.softmax(sim, axis=-1)
    ctx = jnp.einsum("bnm,bmv->bnv", sim, v)
    out = ctx @ params["wo"] + params["bo"]
    return jnp.transpose(out, (0, 2, 1)).reshape(B, -1, H, W)


if __name__ == "__main__":
    B, Cin, H, W = 2, 4, 16, 16
    key_channels, value_channels = 4, 4

    key = jax.random.PRNGKey(0)
    kx, kp, ko = jax.random.split(key, 3)
    x = jax.random.normal(kx, (B, Cin, H, W), dtype=jnp.float32)

    # (1) Module-faithful init: f_out is zero-initialized -> output must be all zeros.
    params = init_params(kp, Cin, key_channels, value_channels)
    out0 = jax.block_until_ready(self_attention_block(x, params))
    assert out0.shape == (B, Cin, H, W)
    np.testing.assert_allclose(np.asarray(out0), 0.0, atol=1e-6)

    # (2) Test-only non-zero f_out so the comparison exercises the attention math.
    bound = 1.0 / math.sqrt(value_channels)
    k1, k2 = jax.random.split(ko)
    params_t = dict(params)
    params_t["wo"] = jax.random.uniform(k1, (value_channels, Cin), jnp.float32, -bound, bound)
    params_t["bo"] = jax.random.uniform(k2, (Cin,), jnp.float32, -bound, bound)

    out = jax.block_until_ready(self_attention_block(x, params_t))
    ref = reference_jax(x, params_t, key_channels)
    # Tolerance reflects bf16 streams / bf16 logits+exp with f32 accumulation everywhere;
    # the softmax normalization now uses the exact reciprocal.
    np.testing.assert_allclose(np.asarray(out), np.asarray(ref), atol=2e-2, rtol=2e-2)

    print("KERNEL_OK")
</pallas_src>

<mosaic_0001>
module attributes {stable_mosaic.version = 11 : i64} {
  func.func @_projection_kernel(%arg0: i32, %arg1: i32, %arg2: memref<1x256x4xbf16, #tpu.memory_space<vmem>>, %arg3: memref<4x128xbf16, #tpu.memory_space<vmem>>, %arg4: memref<1x128xf32, #tpu.memory_space<vmem>>, %arg5: memref<4x128xbf16, #tpu.memory_space<vmem>>, %arg6: memref<1x128xf32, #tpu.memory_space<vmem>>, %arg7: memref<1x256x128xbf16, #tpu.memory_space<vmem>>, %arg8: memref<1x256x128xbf16, #tpu.memory_space<vmem>>) attributes {dimension_semantics = [#tpu.dimension_semantics<parallel>, #tpu.dimension_semantics<parallel>], iteration_bounds = array<i64: 2, 1>, scalar_prefetch = 0 : i64, scratch_operands = 0 : i64, tpu.core_type = #tpu.core_type<tc>, window_params = [{transform_indices = @transform_0, window_bounds = array<i64: 1, 256, 4>}, {pipeline_mode = #tpu.pipeline_mode<synchronous>, transform_indices = @transform_1, window_bounds = array<i64: 4, 128>}, {pipeline_mode = #tpu.pipeline_mode<synchronous>, transform_indices = @transform_2, window_bounds = array<i64: 1, 128>}, {pipeline_mode = #tpu.pipeline_mode<synchronous>, transform_indices = @transform_3, window_bounds = array<i64: 4, 128>}, {pipeline_mode = #tpu.pipeline_mode<synchronous>, transform_indices = @transform_4, window_bounds = array<i64: 1, 128>}, {transform_indices = @transform_5, window_bounds = array<i64: 1, 256, 128>}, {transform_indices = @transform_6, window_bounds = array<i64: 1, 256, 128>}]} {
    %c0 = arith.constant 0 : index
    %c0_0 = arith.constant 0 : index
    %c0_1 = arith.constant 0 : index
    %0 = vector.load %arg2[%c0, %c0_0, %c0_1] : memref<1x256x4xbf16, #tpu.memory_space<vmem>>, vector<1x256x4xbf16>
    %1 = vector.shape_cast %0 : vector<1x256x4xbf16> to vector<256x4xbf16>
    %c0_2 = arith.constant 0 : index
    %c0_3 = arith.constant 0 : index
    %2 = vector.load %arg3[%c0_2, %c0_3] : memref<4x128xbf16, #tpu.memory_space<vmem>>, vector<4x128xbf16>
    %cst = arith.constant dense<0.000000e+00> : vector<256x128xf32>
    %3 = tpu.matmul %1, %2, %cst {dimension_numbers = #tpu.dot_dimension_numbers<[1], [0], [0], [1], [0, 0, 1, 1], [], []>} : vector<256x4xbf16>, vector<4x128xbf16>, vector<256x128xf32> -> vector<256x128xf32>
    %c0_4 = arith.constant 0 : index
    %c0_5 = arith.constant 0 : index
    %4 = vector.load %arg4[%c0_4, %c0_5] : memref<1x128xf32, #tpu.memory_space<vmem>>, vector<1x128xf32>
    %5 = vector.broadcast %4 : vector<1x128xf32> to vector<256x128xf32>
    %6 = arith.addf %3, %5 : vector<256x128xf32>
    %c0_6 = arith.constant 0 : index
    %c0_7 = arith.constant 0 : index
    %7 = vector.load %arg5[%c0_6, %c0_7] : memref<4x128xbf16, #tpu.memory_space<vmem>>, vector<4x128xbf16>
    %cst_8 = arith.constant dense<0.000000e+00> : vector<256x128xf32>
    %8 = tpu.matmul %1, %7, %cst_8 {dimension_numbers = #tpu.dot_dimension_numbers<[1], [0], [0], [1], [0, 0, 1, 1], [], []>} : vector<256x4xbf16>, vector<4x128xbf16>, vector<256x128xf32> -> vector<256x128xf32>
    %c0_9 = arith.constant 0 : index
    %c0_10 = arith.constant 0 : index
    %9 = vector.load %arg6[%c0_9, %c0_10] : memref<1x128xf32, #tpu.memory_space<vmem>>, vector<1x128xf32>
    %10 = vector.broadcast %9 : vector<1x128xf32> to vector<256x128xf32>
    %11 = arith.addf %8, %10 : vector<256x128xf32>
    %12 = arith.truncf %6 : vector<256x128xf32> to vector<256x128xbf16>
    %c0_11 = arith.constant 0 : index
    %c0_12 = arith.constant 0 : index
    %c0_13 = arith.constant 0 : index
    %13 = vector.load %arg7[%c0_11, %c0_12, %c0_13] : memref<1x256x128xbf16, #tpu.memory_space<vmem>>, vector<1x256x128xbf16>
    %14 = vector.shape_cast %13 : vector<1x256x128xbf16> to vector<256x128xbf16>
    %15 = vector.shape_cast %12 : vector<256x128xbf16> to vector<1x256x128xbf16>
    tpu.vector_store %arg7[%c0_11, %c0_12, %c0_13], %15 {strides = array<i32>} : memref<1x256x128xbf16, #tpu.memory_space<vmem>>, vector<1x256x128xbf16>,
    %16 = arith.truncf %11 : vector<256x128xf32> to vector<256x128xbf16>
    %c0_14 = arith.constant 0 : index
    %c0_15 = arith.constant 0 : index
    %c0_16 = arith.constant 0 : index
    %17 = vector.load %arg8[%c0_14, %c0_15, %c0_16] : memref<1x256x128xbf16, #tpu.memory_space<vmem>>, vector<1x256x128xbf16>
    %18 = vector.shape_cast %17 : vector<1x256x128xbf16> to vector<256x128xbf16>
    %19 = vector.shape_cast %16 : vector<256x128xbf16> to vector<1x256x128xbf16>
    tpu.vector_store %arg8[%c0_14, %c0_15, %c0_16], %19 {strides = array<i32>} : memref<1x256x128xbf16, #tpu.memory_space<vmem>>, vector<1x256x128xbf16>,
    return
  }
  func.func @transform_0(%arg0: i32, %arg1: i32) -> (i32, i32, i32) {
    %c0_i32 = arith.constant 0 : i32
    %c0_i32_0 = arith.constant 0 : i32
    return %arg0, %arg1, %c0_i32 : i32, i32, i32
  }
  func.func @transform_1(%arg0: i32, %arg1: i32) -> (i32, i32) {
    %c0_i32 = arith.constant 0 : i32
    %c0_i32_0 = arith.constant 0 : i32
    %c0_i32_1 = arith.constant 0 : i32
    return %c0_i32, %c0_i32_0 : i32, i32
  }
  func.func @transform_2(%arg0: i32, %arg1: i32) -> (i32, i32) {
    %c0_i32 = arith.constant 0 : i32
    %c0_i32_0 = arith.constant 0 : i32
    %c0_i32_1 = arith.constant 0 : i32
    return %c0_i32, %c0_i32_0 : i32, i32
  }
  func.func @transform_3(%arg0: i32, %arg1: i32) -> (i32, i32) {
    %c0_i32 = arith.constant 0 : i32
    %c0_i32_0 = arith.constant 0 : i32
    %c0_i32_1 = arith.constant 0 : i32
    return %c0_i32, %c0_i32_0 : i32, i32
  }
  func.func @transform_4(%arg0: i32, %arg1: i32) -> (i32, i32) {
    %c0_i32 = arith.constant 0 : i32
    %c0_i32_0 = arith.constant 0 : i32
    %c0_i32_1 = arith.constant 0 : i32
    return %c0_i32, %c0_i32_0 : i32, i32
  }
  func.func @transform_5(%arg0: i32, %arg1: i32) -> (i32, i32, i32) {
    %c0_i32 = arith.constant 0 : i32
    %c0_i32_0 = arith.constant 0 : i32
    return %arg0, %arg1, %c0_i32 : i32, i32, i32
  }
  func.func @transform_6(%arg0: i32, %arg1: i32) -> (i32, i32, i32) {
    %c0_i32 = arith.constant 0 : i32
    %c0_i32_0 = arith.constant 0 : i32
    return %arg0, %arg1, %c0_i32 : i32, i32, i32
  }
}

</mosaic_0001>

<bundles_post_ra>
// kernel: tpu_custom_call.1
= control target key start
LH: loop header
LB: loop body
LE: loop exit
PB: predicated region body
PF: predicated region fallthrough
CT: control target
= control target key end

     0   :  { %12 = vsyncpa [#allocation3], 0  ;;  %s2311_s0 = inlined_call_operand.vmem [shape: bf16[2,256,4], index: 0, kind: input, shape index: {}]   ;;  %s2312_s1 = inlined_call_operand.vmem [shape: bf16[4,128], index: 1, kind: input, shape index: {}]   ;;  %s2313_s2 = inlined_call_operand.vmem [shape: f32[1,128], index: 2, kind: input, shape index: {}]   ;;  %s2314_s3 = inlined_call_operand.vmem [shape: bf16[4,128], index: 3, kind: input, shape index: {}]   ;;  %s2315_s4 = inlined_call_operand.vmem [shape: f32[1,128], index: 4, kind: input, shape index: {}]   ;;  %s2316_s5 = inlined_call_operand.hbm [shape: bf16[2,256,128], index: 5, kind: output, shape index: {0}]   ;;  %s2317_s6 = inlined_call_operand.hbm [shape: bf16[2,256,128], index: 6, kind: output, shape index: {1}]  }
   0x1   :  { %14 = vsyncpa [#allocation3 + $0x1], 0 }
   0x2   :  { %15 = vsyncpa [#allocation5], 0 }
   0x3   :  { %17 = vsyncpa [#allocation5 + $0x1], 0  ;;  %s1992_s21 = smov 0   ;;  %s1994_s22 = smov 0  }
   0x4   :  { %s1996_s23 = smov 0   ;;  %s1998_s24 = smov 0  }
   0x5   :  { %s2000_s25 = smov 0   ;;  %s2002_s26 = smov 0  }
   0x6 LB: > { %s1275_s27 = sadd.s32 4294967295, %s1951_s26   ;;  %s1276_s28 = sadd.s32 4294967294, %s1951_s26   ;;  %s1951_s26 = sphi %s2002_s26, %s23_s26   ;;  %s1947_s25 = sphi %s2000_s25, %s2324_s25   ;;  %s1943_s24 = sphi %s1998_s24, %s2323_s24   ;;  %s1939_s23 = sphi %s1996_s23, %s2322_s23   ;;  %s1935_s22 = sphi %s1994_s22, %s2321_s22   ;;  %s1931_s21 = sphi %s1992_s21, %s2320_s21  }
   0x7   : > { %s35_s29 = sadd.s32 1, %s1947_s25  ;;  %s156_s30 = sadd.s32 1, %s1939_s23 }
   0x8   : > { %p37_p0 = scmp.ge.s32.totalorder %s35_s29, 2  ;;  %p166_p1 = scmp.ne.s32.totalorder %s1939_s23, %s1935_s22 }
   0x9   : > { %p167_p2 = scmp.eq.s32.totalorder %s1275_s27, 1  ;;  %p172_p3 = scmp.ne.s32.totalorder %s1935_s22, %s1931_s21 }
   0xa   : > { %s2326_s29 = smov (%p37_p0, %s35_s29), 0  ;;  %p173_p5 = scmp.eq.s32.totalorder %s1276_s28, 1 }
   0xb   : > { %p2032_p4 = por %p167_p2, %p166_p1  ;;  %s151_s8 = ssub.s32 %s1947_s25, %s2326_s29 }
   0xc   : > { %p1279_p6 = scmp.ge.s32.totalorder %s1951_s26, 1  ;;  %p154_p7 = scmp.eq.s32.totalorder %s151_s8, 0 }
   0xd   : > { %p2039_p8 = por %p173_p5, %p172_p3  ;;  %p244_p9 = scmp.lt.s32.totalorder %s1951_s26, 3 }
   0xe   : > { %s2045_s10 = scalar_select %p154_p7, %s1939_s23, %s156_s30  }
   0xf   : > { %p245_p10 = pnand %p1279_p6, %p244_p9 }
  0x10   : > { %p284_p11 = scmp.lt.s32.totalorder (!%p245_p10), %s1943_s24, 1  ;;  %s2109_s20 = sand.u32 (!%p245_p10), 1, %s1935_s22  }
  0x11   : > { %248 = sbr.rel (%p245_p10) target bundleno = 323 (0x143), region = 40  ;;  %s1280_s11 = sshll.u32 (!%p245_p10), %s2109_s20, 7 }
  0x12   : > { %s2130_s12 = scalar_lea.vmem (!%p245_p10), [#allocation2], %s1280_s11  ;;  %s2133_s13 = scalar_lea.vmem (!%p245_p10), [#allocation4], %s1280_s11 }
  0x13   : > { %s1471_s14 = sshll.u32 (!%p245_p10), %s1943_s24, 11  ;;  %s1123_s30 = scalar_lea.sflag (!%p245_p10), [#allocation3], %s2109_s20 }
  0x14   : > { %s2224_s18 = scalar_lea.hbm (!%p245_p10), %s2316_s5, %s1471_s14  ;;  %s2233_s28 = scalar_lea.hbm (!%p245_p10), %s2317_s6, %s1471_s14 }
  0x15   : > { %s1953_s11 = smov (!%p245_p10), [#allocation2]  }
  0x16   : > { %v328_v0 = vld [vmem:[%s2312_s1] sm:$0x3]  ;;  %vm465_vm0 = vcmask 1041408   ;;  %s285_s15 = scalar_select %p284_p11, %s1943_s24, 1  ;;  %vm416_vm1 = vcmask 31744  }
  0x17   : > { %v630_v1 = vld [vmem:[%s2314_s3] sm:$0x3]  ;;  %1765 = vmatprep.subr.msk.bf16.mxu0 %vm465_vm0, %v328_v0  ;;  %v467_v2 = vsel %vm465_vm0, %v328_v0, 0  ;;  %s1849_s17 = sshll.u32 %s1953_s11, 4  ;;  %s1850_s17 = int_to_ptr.vmem [resolvable:$false] %s1849_s17 }
  0x18   : > { %1766 = vmatprep.subr.msk.bf16.mxu1 %vm465_vm0, %v630_v1  ;;  %v639_v3 = vsel %vm465_vm0, %v630_v1, 0  ;;  %1698 = vmatpush3.bf16.msra.mxu0 %v467_v2  ;;  %s1406_s16 = sshll.u32 %s285_s15, 7  ;;  %v2114_v22 = vld [vmem:[%s2313_s2] ss:$0 sm:$0xff]  ;;  %s1143_s15 = sshll.u32 %s2130_s12, 4  ;;  %s2226_s15 = int_to_ptr.vmem [resolvable:$true] %s1143_s15 }
  0x19   : > { %1732 = vmatpush3.bf16.msra.mxu1 %v639_v3  ;;  %s2058_s19 = scalar_lea.vmem %s2311_s0, %s1406_s16  ;;  %v2119_v23 = vld [vmem:[%s2315_s4] ss:$0 sm:$0xff]  ;;  %s1161_s16 = sshll.u32 %s2133_s13, 4  ;;  %s2235_s16 = int_to_ptr.vmem [resolvable:$true] %s1161_s16 }
  0x1a   : > { %v1829_v4 = vld [vmem:[%s2058_s19] sm:$0xff]   ;;  %v1830_v5 = vld [vmem:[%s2058_s19 + $0x8] sm:$0xff]   ;;  %v1831_v6 = vld [vmem:[%s2058_s19 + $0x10] sm:$0xff]   ;;  %s1845_s8 = scalar_lea.vmem %s2226_s15, 2048  ;;  %s1851_s24 = scalar_lea.vmem %s1850_s17, 4096 }
  0x1b   : > { %1699 = vmatprep.mubr.msk.bf16.mxu0 %vm416_vm1, %v1829_v4  ;;  %1733 = vmatprep.mubr.msk.bf16.mxu1 %vm416_vm1, %v1829_v4  ;;  %v1832_v7 = vld [vmem:[%s2058_s19 + $0x18] sm:$0xff]   ;;  %v1833_v8 = vld [vmem:[%s2058_s19 + $0x20] sm:$0xff]   ;;  %v1834_v9 = vld [vmem:[%s2058_s19 + $0x28] sm:$0xff]   ;;  %p1846_p12 = scmp.ne.s32.totalorder %s2226_s15, %s1845_s8  ;;  %p1852_p1 = scmp.lt.s32.totalorder %s2226_s15, %s1850_s17 }
  0x1c   : > { %1700 = vmatmul.mubr.msk.bf16.vlgmr.msra.gmra.mxu0 %vm416_vm1, %v1830_v5  ;;  %1734 = vmatmul.mubr.msk.bf16.vlgmr.msra.gmra.mxu1 %vm416_vm1, %v1830_v5  ;;  %v1835_v10 = vld [vmem:[%s2058_s19 + $0x30] sm:$0xff]   ;;  %v1836_v11 = vld [vmem:[%s2058_s19 + $0x38] sm:$0xff]   ;;  %v1837_v12 = vld [vmem:[%s2058_s19 + $0x40] sm:$0xff]   ;;  %p1853_p2 = scmp.lt.s32.totalorder %s1851_s24, %s1845_s8 }
  0x1d   : > { %1703 = vmatprep.mubr.msk.bf16.mxu0 %vm416_vm1, %v1831_v6  ;;  %1737 = vmatprep.mubr.msk.bf16.mxu1 %vm416_vm1, %v1831_v6  ;;  %v1838_v13 = vld [vmem:[%s2058_s19 + $0x48] sm:$0xff]   ;;  %v1839_v14 = vld [vmem:[%s2058_s19 + $0x50] sm:$0xff]   ;;  %v1840_v15 = vld [vmem:[%s2058_s19 + $0x58] sm:$0xff]   ;;  %p1847_p13 = pnand %p1846_p12, %p2032_p4 }
  0x1e   : > { %v1841_v16 = vld [vmem:[%s2058_s19 + $0x60] sm:$0xff]   ;;  %v1842_v17 = vld [vmem:[%s2058_s19 + $0x68] sm:$0xff]   ;;  %v1843_v18 = vld [vmem:[%s2058_s19 + $0x70] sm:$0xff]   ;;  %p1854_p3 = por %p1853_p2, %p1852_p1 }
  0x1f   : > { %v1844_v19 = vld [vmem:[%s2058_s19 + $0x78] sm:$0xff]   ;;  %p1848_p0 = pneg %p1847_p13 }
  0x21   : > { %p1855_p5 = pnand %p1854_p3, %p1848_p0 }
  0x24   : > { %1704 = vmatmul.mubr.msk.bf16.gmra.mxu0 %vm416_vm1, %v1832_v7  ;;  %1738 = vmatmul.mubr.msk.bf16.gmra.mxu1 %vm416_vm1, %v1832_v7 }
  0x25   : > { %1707 = vmatprep.mubr.msk.bf16.mxu0 %vm416_vm1, %v1833_v8  ;;  %1741 = vmatprep.mubr.msk.bf16.mxu1 %vm416_vm1, %v1833_v8 }
  0x2c   : > { %1708 = vmatmul.mubr.msk.bf16.gmra.mxu0 %vm416_vm1, %v1834_v9  ;;  %1742 = vmatmul.mubr.msk.bf16.gmra.mxu1 %vm416_vm1, %v1834_v9 }
  0x2d   : > { %1711 = vmatprep.mubr.msk.bf16.mxu0 %vm416_vm1, %v1835_v10  ;;  %1745 = vmatprep.mubr.msk.bf16.mxu1 %vm416_vm1, %v1835_v10 }
  0x34   : > { %1712 = vmatmul.mubr.msk.bf16.gmra.mxu0 %vm416_vm1, %v1836_v11  ;;  %1746 = vmatmul.mubr.msk.bf16.gmra.mxu1 %vm416_vm1, %v1836_v11 }
  0x35   : > { %1715 = vmatprep.mubr.msk.bf16.mxu0 %vm416_vm1, %v1837_v12  ;;  %1749 = vmatprep.mubr.msk.bf16.mxu1 %vm416_vm1, %v1837_v12 }
  0x3c   : > { %1716 = vmatmul.mubr.msk.bf16.gmra.mxu0 %vm416_vm1, %v1838_v13  ;;  %1750 = vmatmul.mubr.msk.bf16.gmra.mxu1 %vm416_vm1, %v1838_v13 }
  0x3d   : > { %1719 = vmatprep.mubr.msk.bf16.mxu0 %vm416_vm1, %v1839_v14  ;;  %1753 = vmatprep.mubr.msk.bf16.mxu1 %vm416_vm1, %v1839_v14 }
  0x44   : > { %1720 = vmatmul.mubr.msk.bf16.gmra.mxu0 %vm416_vm1, %v1840_v15  ;;  %1754 = vmatmul.mubr.msk.bf16.gmra.mxu1 %vm416_vm1, %v1840_v15 }
  0x45   : > { %1723 = vmatprep.mubr.msk.bf16.mxu0 %vm416_vm1, %v1841_v16  ;;  %1757 = vmatprep.mubr.msk.bf16.mxu1 %vm416_vm1, %v1841_v16 }
  0x4c   : > { %1724 = vmatmul.mubr.msk.bf16.gmra.mxu0 %vm416_vm1, %v1842_v17  ;;  %1758 = vmatmul.mubr.msk.bf16.gmra.mxu1 %vm416_vm1, %v1842_v17 }
  0x4d   : > { %1727 = vmatprep.mubr.msk.bf16.mxu0 %vm416_vm1, %v1843_v18  ;;  %1761 = vmatprep.mubr.msk.bf16.mxu1 %vm416_vm1, %v1843_v18 }
  0x54   : > { %1728 = vmatmul.mubr.msk.bf16.gmra.mxu0 %vm416_vm1, %v1844_v19  ;;  %1762 = vmatmul.mubr.msk.bf16.gmra.mxu1 %vm416_vm1, %v1844_v19 }
  0xdc   : > { %v1701_v20 = vpop.f32.mrf.mxu0  ;;  %v1735_v21 = vpop.f32.mrf.mxu1 }
  0xdd   : > { %v512_v28 = vadd.f32 %v1701_v20, %v2114_v22  ;;  %v684_v29 = vadd.f32 %v1735_v21, %v2119_v23 }
  0xde   : > { %v503_v24 = vpop.f32.mrf.mxu0  ;;  %v675_v25 = vpop.f32.mrf.mxu1 }
  0xdf   : > { %v504_v32 = vadd.f32 %v2114_v22, %v503_v24  ;;  %v676_v33 = vadd.f32 %v2119_v23, %v675_v25 }
  0xe0   : > { %v1702_v26 = vpop.f32.mrf.mxu0  ;;  %v1736_v27 = vpop.f32.mrf.mxu1 }
  0xe1   : > { %v515_v30 = vadd.f32 %v1702_v26, %v2114_v22  ;;  %v687_v31 = vadd.f32 %v1736_v27, %v2119_v23 }
  0xe2   : > { %v506_v34 = vpop.f32.mrf.mxu0  ;;  %v678_v35 = vpop.f32.mrf.mxu1 }
  0xe3   : > { %v1481_v36 = vpack.c.bf16 %v515_v30, %v512_v28  ;;  %v1561_v37 = vpack.c.bf16 %v687_v31, %v684_v29  ;;  %v507_v38 = vadd.f32 %v2114_v22, %v506_v34  ;;  %v679_v39 = vadd.f32 %v2119_v23, %v678_v35 }
  0xe4   : > { %v1705_v40 = vpop.f32.mrf.mxu0  ;;  %v1739_v41 = vpop.f32.mrf.mxu1 }
  0xe5   : > { %1633 = vst [vmem:[%s2130_s12 + $0x8] sm:$0xff] %v1481_v36   ;;  %1648 = vst [vmem:[%s2133_s13 + $0x8] sm:$0xff] %v1561_v37   ;;  %v1476_v42 = vpack.c.bf16 %v507_v38, %v504_v32  ;;  %v1556_v43 = vpack.c.bf16 %v679_v39, %v676_v33  ;;  %v528_v48 = vadd.f32 %v1705_v40, %v2114_v22 }
  0xe6   : > { %v519_v44 = vpop.f32.mrf.mxu0  ;;  %v691_v45 = vpop.f32.mrf.mxu1  ;;  %v700_v49 = vadd.f32 %v1739_v41, %v2119_v23 }
  0xe7   : > { %1477 = vst [vmem:[%s2130_s12] sm:$0xff] %v1476_v42   ;;  %1557 = vst [vmem:[%s2133_s13] sm:$0xff] %v1556_v43   ;;  %v520_v52 = vadd.f32 %v2114_v22, %v519_v44  ;;  %v692_v53 = vadd.f32 %v2119_v23, %v691_v45 }
  0xe8   : > { %v1706_v46 = vpop.f32.mrf.mxu0  ;;  %v1740_v47 = vpop.f32.mrf.mxu1 }
  0xe9   : > { %v531_v50 = vadd.f32 %v1706_v46, %v2114_v22  ;;  %v703_v51 = vadd.f32 %v1740_v47, %v2119_v23 }
  0xea   : > { %v522_v54 = vpop.f32.mrf.mxu0  ;;  %v694_v55 = vpop.f32.mrf.mxu1 }
  0xeb   : > { %v1491_v56 = vpack.c.bf16 %v531_v50, %v528_v48  ;;  %v1571_v57 = vpack.c.bf16 %v703_v51, %v700_v49  ;;  %v523_v58 = vadd.f32 %v2114_v22, %v522_v54  ;;  %v695_v59 = vadd.f32 %v2119_v23, %v694_v55 }
  0xec   : > { %v1709_v60 = vpop.f32.mrf.mxu0  ;;  %v1743_v61 = vpop.f32.mrf.mxu1 }
  0xed   : > { %1635 = vst [vmem:[%s2130_s12 + $0x18] sm:$0xff] %v1491_v56   ;;  %1650 = vst [vmem:[%s2133_s13 + $0x18] sm:$0xff] %v1571_v57   ;;  %v1486_v62 = vpack.c.bf16 %v523_v58, %v520_v52  ;;  %v1566_v63 = vpack.c.bf16 %v695_v59, %v692_v53  ;;  %v544_v4 = vadd.f32 %v1709_v60, %v2114_v22 }
  0xee   : > { %v535_v0 = vpop.f32.mrf.mxu0  ;;  %v707_v1 = vpop.f32.mrf.mxu1  ;;  %v716_v5 = vadd.f32 %v1743_v61, %v2119_v23 }
  0xef   : > { %1634 = vst [vmem:[%s2130_s12 + $0x10] sm:$0xff] %v1486_v62   ;;  %1649 = vst [vmem:[%s2133_s13 + $0x10] sm:$0xff] %v1566_v63   ;;  %v536_v8 = vadd.f32 %v2114_v22, %v535_v0  ;;  %v708_v9 = vadd.f32 %v2119_v23, %v707_v1 }
  0xf0   : > { %v1710_v2 = vpop.f32.mrf.mxu0  ;;  %v1744_v3 = vpop.f32.mrf.mxu1 }
  0xf1   : > { %v547_v6 = vadd.f32 %v1710_v2, %v2114_v22  ;;  %v719_v7 = vadd.f32 %v1744_v3, %v2119_v23 }
  0xf2   : > { %v538_v10 = vpop.f32.mrf.mxu0  ;;  %v710_v11 = vpop.f32.mrf.mxu1 }
  0xf3   : > { %v1501_v12 = vpack.c.bf16 %v547_v6, %v544_v4  ;;  %v1581_v13 = vpack.c.bf16 %v719_v7, %v716_v5  ;;  %v539_v14 = vadd.f32 %v2114_v22, %v538_v10  ;;  %v711_v15 = vadd.f32 %v2119_v23, %v710_v11 }
  0xf4   : > { %v1713_v16 = vpop.f32.mrf.mxu0  ;;  %v1747_v17 = vpop.f32.mrf.mxu1 }
  0xf5   : > { %1637 = vst [vmem:[%s2130_s12 + $0x28] sm:$0xff] %v1501_v12   ;;  %1652 = vst [vmem:[%s2133_s13 + $0x28] sm:$0xff] %v1581_v13   ;;  %v1496_v18 = vpack.c.bf16 %v539_v14, %v536_v8  ;;  %v1576_v19 = vpack.c.bf16 %v711_v15, %v708_v9  ;;  %v560_v26 = vadd.f32 %v1713_v16, %v2114_v22 }
  0xf6   : > { %v551_v20 = vpop.f32.mrf.mxu0  ;;  %v723_v21 = vpop.f32.mrf.mxu1  ;;  %v732_v27 = vadd.f32 %v1747_v17, %v2119_v23 }
  0xf7   : > { %1636 = vst [vmem:[%s2130_s12 + $0x20] sm:$0xff] %v1496_v18   ;;  %1651 = vst [vmem:[%s2133_s13 + $0x20] sm:$0xff] %v1576_v19   ;;  %v552_v30 = vadd.f32 %v2114_v22, %v551_v20  ;;  %v724_v31 = vadd.f32 %v2119_v23, %v723_v21 }
  0xf8   : > { %v1714_v24 = vpop.f32.mrf.mxu0  ;;  %v1748_v25 = vpop.f32.mrf.mxu1 }
  0xf9   : > { %v563_v28 = vadd.f32 %v1714_v24, %v2114_v22  ;;  %v735_v29 = vadd.f32 %v1748_v25, %v2119_v23 }
  0xfa   : > { %v554_v32 = vpop.f32.mrf.mxu0  ;;  %v726_v33 = vpop.f32.mrf.mxu1 }
  0xfb   : > { %v1511_v34 = vpack.c.bf16 %v563_v28, %v560_v26  ;;  %v1591_v35 = vpack.c.bf16 %v735_v29, %v732_v27  ;;  %v555_v36 = vadd.f32 %v2114_v22, %v554_v32  ;;  %v727_v37 = vadd.f32 %v2119_v23, %v726_v33 }
  0xfc   : > { %v1717_v38 = vpop.f32.mrf.mxu0  ;;  %v1751_v39 = vpop.f32.mrf.mxu1 }
  0xfd   : > { %1639 = vst [vmem:[%s2130_s12 + $0x38] sm:$0xff] %v1511_v34   ;;  %1654 = vst [vmem:[%s2133_s13 + $0x38] sm:$0xff] %v1591_v35   ;;  %v1506_v40 = vpack.c.bf16 %v555_v36, %v552_v30  ;;  %v1586_v41 = vpack.c.bf16 %v727_v37, %v724_v31  ;;  %v576_v46 = vadd.f32 %v1717_v38, %v2114_v22 }
  0xfe   : > { %v567_v42 = vpop.f32.mrf.mxu0  ;;  %v739_v43 = vpop.f32.mrf.mxu1  ;;  %v748_v47 = vadd.f32 %v1751_v39, %v2119_v23 }
  0xff   : > { %1638 = vst [vmem:[%s2130_s12 + $0x30] sm:$0xff] %v1506_v40   ;;  %1653 = vst [vmem:[%s2133_s13 + $0x30] sm:$0xff] %v1586_v41   ;;  %v568_v50 = vadd.f32 %v2114_v22, %v567_v42  ;;  %v740_v51 = vadd.f32 %v2119_v23, %v739_v43 }
 0x100   : > { %v1718_v44 = vpop.f32.mrf.mxu0  ;;  %v1752_v45 = vpop.f32.mrf.mxu1 }
 0x101   : > { %v579_v48 = vadd.f32 %v1718_v44, %v2114_v22  ;;  %v751_v49 = vadd.f32 %v1752_v45, %v2119_v23 }
 0x102   : > { %v570_v52 = vpop.f32.mrf.mxu0  ;;  %v742_v53 = vpop.f32.mrf.mxu1 }
 0x103   : > { %v1521_v54 = vpack.c.bf16 %v579_v48, %v576_v46  ;;  %v1601_v55 = vpack.c.bf16 %v751_v49, %v748_v47  ;;  %v571_v56 = vadd.f32 %v2114_v22, %v570_v52  ;;  %v743_v57 = vadd.f32 %v2119_v23, %v742_v53 }
 0x104   : > { %v1721_v58 = vpop.f32.mrf.mxu0  ;;  %v1755_v59 = vpop.f32.mrf.mxu1 }
 0x105   : > { %1641 = vst [vmem:[%s2130_s12 + $0x48] sm:$0xff] %v1521_v54   ;;  %1656 = vst [vmem:[%s2133_s13 + $0x48] sm:$0xff] %v1601_v55   ;;  %v1516_v60 = vpack.c.bf16 %v571_v56, %v568_v50  ;;  %v1596_v61 = vpack.c.bf16 %v743_v57, %v740_v51  ;;  %v592_v2 = vadd.f32 %v1721_v58, %v2114_v22 }
 0x106   : > { %v583_v62 = vpop.f32.mrf.mxu0  ;;  %v755_v63 = vpop.f32.mrf.mxu1  ;;  %v764_v3 = vadd.f32 %v1755_v59, %v2119_v23 }
 0x107   : > { %1640 = vst [vmem:[%s2130_s12 + $0x40] sm:$0xff] %v1516_v60   ;;  %1655 = vst [vmem:[%s2133_s13 + $0x40] sm:$0xff] %v1596_v61   ;;  %v584_v6 = vadd.f32 %v2114_v22, %v583_v62  ;;  %v756_v7 = vadd.f32 %v2119_v23, %v755_v63 }
 0x108   : > { %v1722_v0 = vpop.f32.mrf.mxu0  ;;  %v1756_v1 = vpop.f32.mrf.mxu1 }
 0x109   : > { %v595_v4 = vadd.f32 %v1722_v0, %v2114_v22  ;;  %v767_v5 = vadd.f32 %v1756_v1, %v2119_v23 }
 0x10a   : > { %v586_v8 = vpop.f32.mrf.mxu0  ;;  %v758_v9 = vpop.f32.mrf.mxu1 }
 0x10b   : > { %v1531_v10 = vpack.c.bf16 %v595_v4, %v592_v2  ;;  %v1611_v11 = vpack.c.bf16 %v767_v5, %v764_v3  ;;  %v587_v12 = vadd.f32 %v2114_v22, %v586_v8  ;;  %v759_v13 = vadd.f32 %v2119_v23, %v758_v9 }
 0x10c   : > { %v1725_v14 = vpop.f32.mrf.mxu0  ;;  %v1759_v15 = vpop.f32.mrf.mxu1 }
 0x10d   : > { %1643 = vst [vmem:[%s2130_s12 + $0x58] sm:$0xff] %v1531_v10   ;;  %1658 = vst [vmem:[%s2133_s13 + $0x58] sm:$0xff] %v1611_v11   ;;  %v1526_v16 = vpack.c.bf16 %v587_v12, %v584_v6  ;;  %v1606_v17 = vpack.c.bf16 %v759_v13, %v756_v7  ;;  %v608_v24 = vadd.f32 %v1725_v14, %v2114_v22 }
 0x10e   : > { %v599_v18 = vpop.f32.mrf.mxu0  ;;  %v771_v19 = vpop.f32.mrf.mxu1  ;;  %v780_v25 = vadd.f32 %v1759_v15, %v2119_v23 }
 0x10f   : > { %1642 = vst [vmem:[%s2130_s12 + $0x50] sm:$0xff] %v1526_v16   ;;  %1657 = vst [vmem:[%s2133_s13 + $0x50] sm:$0xff] %v1606_v17   ;;  %v600_v28 = vadd.f32 %v2114_v22, %v599_v18  ;;  %v772_v29 = vadd.f32 %v2119_v23, %v771_v19 }
 0x110   : > { %v1726_v20 = vpop.f32.mrf.mxu0  ;;  %v1760_v21 = vpop.f32.mrf.mxu1 }
 0x111   : > { %v611_v26 = vadd.f32 %v1726_v20, %v2114_v22  ;;  %v783_v27 = vadd.f32 %v1760_v21, %v2119_v23 }
 0x112   : > { %v602_v30 = vpop.f32.mrf.mxu0  ;;  %v774_v31 = vpop.f32.mrf.mxu1 }
 0x113   : > { %v1541_v32 = vpack.c.bf16 %v611_v26, %v608_v24  ;;  %v1621_v33 = vpack.c.bf16 %v783_v27, %v780_v25  ;;  %v603_v34 = vadd.f32 %v2114_v22, %v602_v30  ;;  %v775_v35 = vadd.f32 %v2119_v23, %v774_v31 }
 0x114   : > { %v1729_v36 = vpop.f32.mrf.mxu0  ;;  %v1763_v37 = vpop.f32.mrf.mxu1 }
 0x115   : > { %1645 = vst [vmem:[%s2130_s12 + $0x68] sm:$0xff] %v1541_v32   ;;  %1660 = vst [vmem:[%s2133_s13 + $0x68] sm:$0xff] %v1621_v33   ;;  %v1536_v38 = vpack.c.bf16 %v603_v34, %v600_v28  ;;  %v1616_v39 = vpack.c.bf16 %v775_v35, %v772_v29  ;;  %v624_v44 = vadd.f32 %v1729_v36, %v2114_v22 }
 0x116   : > { %v615_v40 = vpop.f32.mrf.mxu0  ;;  %v787_v41 = vpop.f32.mrf.mxu1  ;;  %v796_v45 = vadd.f32 %v1763_v37, %v2119_v23 }
 0x117   : > { %1644 = vst [vmem:[%s2130_s12 + $0x60] sm:$0xff] %v1536_v38   ;;  %1659 = vst [vmem:[%s2133_s13 + $0x60] sm:$0xff] %v1616_v39   ;;  %v616_v48 = vadd.f32 %v2114_v22, %v615_v40  ;;  %v788_v49 = vadd.f32 %v2119_v23, %v787_v41 }
 0x118   : > { %v1730_v42 = vpop.f32.mrf.mxu0  ;;  %v1764_v43 = vpop.f32.mrf.mxu1 }
 0x119   : > { %v627_v46 = vadd.f32 %v1730_v42, %v2114_v22  ;;  %v799_v47 = vadd.f32 %v1764_v43, %v2119_v23 }
 0x11a   : > { %v618_v50 = vpop.f32.mrf.mxu0  ;;  %v790_v51 = vpop.f32.mrf.mxu1 }
 0x11b   : > { %v1551_v52 = vpack.c.bf16 %v627_v46, %v624_v44  ;;  %v1631_v53 = vpack.c.bf16 %v799_v47, %v796_v45  ;;  %v619_v54 = vadd.f32 %v2114_v22, %v618_v50  ;;  %v791_v55 = vadd.f32 %v2119_v23, %v790_v51 }
 0x11d   : > { %1647 = vst [vmem:[%s2130_s12 + $0x78] sm:$0xff] %v1551_v52   ;;  %1662 = vst [vmem:[%s2133_s13 + $0x78] sm:$0xff] %v1631_v53   ;;  %v1546_v56 = vpack.c.bf16 %v619_v54, %v616_v48  ;;  %v1626_v57 = vpack.c.bf16 %v791_v55, %v788_v49 }
 0x11f   : > { %1646 = vst [vmem:[%s2130_s12 + $0x70] sm:$0xff] %v1546_v56   ;;  %1661 = vst [vmem:[%s2133_s13 + $0x70] sm:$0xff] %v1626_v57  }
 0x120   : > { %1858 = shalt.err (!%p1855_p5)
}
 0x121   : > { %s1859_s12 = scalar_lea.hbm %s2224_s18, 2048  ;;  %s1863_s19 = scalar_lea.hbm %s2316_s5, 4096 }
 0x122   : > { %p1860_p6 = scmp.ne.s32.totalorder %s2224_s18, %s1859_s12  ;;  %p1864_p10 = scmp.lt.s32.totalorder %s2224_s18, %s2316_s5 }
 0x123   : > { %p1865_p11 = scmp.lt.s32.totalorder %s1863_s19, %s1859_s12 }
 0x124   : > { %p1861_p7 = pnand %p1860_p6, %p2032_p4 }
 0x125   : > { %p1866_p12 = por %p1865_p11, %p1864_p10 }
 0x126   : > { %p1862_p9 = pneg %p1861_p7 }
 0x128   : > { %p1867_p13 = pnand %p1866_p12, %p1862_p9 }
 0x12a   : > { %1870 = shalt.err (!%p1867_p13)
}
 0x12b   : > { %s1954_s8 = smov 64   ;;  %s1955_s17 = smov 4  }
 0x12c   : > { %1767 = dma.vmem_to_hbm [thread:$0]  (%p2032_p4), %s2226_s15, 2048, %s2224_s18, %s1123_s30, %s1954_s8, %s1954_s8, %s1955_s17  }
 0x12d   : > { %s1128_s24 = scalar_lea.sflag [#allocation5], %s2109_s20  ;;  %s1871_s12 = scalar_lea.vmem %s2235_s16, 2048 }
 0x12e   : > { %p1872_p0 = scmp.ne.s32.totalorder %s2235_s16, %s1871_s12  ;;  %s1956_s13 = smov [#allocation4]  }
 0x12f   : > { %s1875_s14 = sshll.u32 %s1956_s13, 4  ;;  %s1876_s14 = int_to_ptr.vmem [resolvable:$false] %s1875_s14 }
 0x130   : > { %p1873_p1 = pnand %p1872_p0, %p2032_p4  ;;  %s1877_s19 = scalar_lea.vmem %s1876_s14, 4096 }
 0x131   : > { %p1878_p3 = scmp.lt.s32.totalorder %s2235_s16, %s1876_s14  ;;  %p1879_p5 = scmp.lt.s32.totalorder %s1877_s19, %s1871_s12 }
 0x132   : > { %p1874_p2 = pneg %p1873_p1 }
 0x133   : > { %p1880_p6 = por %p1879_p5, %p1878_p3 }
 0x135   : > { %p1881_p7 = pnand %p1880_p6, %p1874_p2 }
 0x137   : > { %1884 = shalt.err (!%p1881_p7)
}
 0x138   : > { %s1885_s15 = scalar_lea.hbm %s2233_s28, 2048  ;;  %s1889_s30 = scalar_lea.hbm %s2317_s6, 4096 }
 0x139   : > { %p1886_p9 = scmp.ne.s32.totalorder %s2233_s28, %s1885_s15  ;;  %p1890_p12 = scmp.lt.s32.totalorder %s2233_s28, %s2317_s6 }
 0x13a   : > { %p1891_p13 = scmp.lt.s32.totalorder %s1889_s30, %s1885_s15 }
 0x13b   : > { %p1887_p10 = pnand %p1886_p9, %p2032_p4 }
 0x13c   : > { %p1892_p0 = por %p1891_p13, %p1890_p12 }
 0x13d   : > { %p1888_p11 = pneg %p1887_p10 }
 0x13f   : > { %p1893_p1 = pnand %p1892_p0, %p1888_p11 }
 0x141   : > { %1896 = shalt.err (!%p1893_p1)
}
 0x142   : > { %1768 = dma.vmem_to_hbm [thread:$0]  (%p2032_p4), %s2235_s16, 2048, %s2233_s28, %s1128_s24, %s1954_s8, %s1954_s8, %s1955_s17  }
 0x143 PF: > { %p1778_p2 = scmp.ge.s32.totalorder %s1951_s26, 2  ;;  %s1176_s12 = sand.u32 1, %s1931_s21  }
 0x144   : > { %s1177_s13 = scalar_lea.sflag [#allocation3], %s1176_s12 }
 0x145   : > { %p1772_p3 = pnand %p1778_p2, %p2039_p8 }
 0x147   : > { %p1773_p5 = pneg %p1772_p3 }
 0x149   : > { %1922 = dma.done.wait (%p1773_p5), %s1177_s13, 2048  }
 0x14a   : > { %1924 = vsyncadd (%p1773_p5), %s1177_s13, 4294965248  ;;  %s1186_s14 = scalar_lea.sflag [#allocation5], %s1176_s12 }
 0x14b   : > { %1926 = dma.done.wait (%p1773_p5), %s1186_s14, 2048  }
 0x14c   : > { %1928 = vsyncadd (%p1773_p5), %s1186_s14, 4294965248  ;;  %s23_s26 = sadd.s32 1, %s1951_s26   ;;  %s2320_s21 = smov %s1935_s22 }
 0x14d   : > { %p20_p6 = scmp.ge.s32.totalorder %s23_s26, 4   ;;  %s2321_s22 = smov %s1939_s23 }
 0x14e   : > { %s2322_s23 = smov %s2045_s10  ;;  %s2323_s24 = smov %s1947_s25 }
 0x14f   : > { %s2324_s25 = smov %s2326_s29  ;;  %22 = sbr.rel (!%p20_p6) target bundleno = 6 (0x6), region = 92 }
 0x154   :  { %1191 = vsyncpa [#allocation3], 1 }
 0x155   :  { %1193 = vsyncpa [#allocation3 + $0x1], 1 }
 0x156   :  { %1194 = vsyncpa [#allocation5], 1 }
 0x157   :  { %1196 = vsyncpa [#allocation5 + $0x1], 1 }

</bundles_post_ra>
